<compile_context>
chip_gen: v6e
topology: v6e:2x2x1
jax: 0.10.0
libtpu: 0.0.40
codegen_flags: <defaults>
</compile_context>

<pallas_src>
import functools

import jax
import jax.numpy as jnp
from jax.experimental import pallas as pl
from jax.experimental.pallas import tpu as pltpu

_HIDDEN = 256
_OUT_PAD = 128  # lane-dense padded output width (action_dim <= 128)


def _round_up(x, m):
    return ((x + m - 1) // m) * m


def _actor_kernel(max_action,
                  state_ref, w1_ref, b1_ref, w2_ref, b2_ref, w3_ref, b3_ref,
                  out_ref):
    # Layer 1: Linear(state_dim -> 256) + ReLU   (MXU matmul, f32 accum)
    a = jnp.dot(state_ref[...], w1_ref[...],
                preferred_element_type=jnp.float32) + b1_ref[...]
    a = jnp.maximum(a, 0.0)

    # Layer 2: Linear(256 -> 256) + ReLU
    a = jnp.dot(a, w2_ref[...],
                preferred_element_type=jnp.float32) + b2_ref[...]
    a = jnp.maximum(a, 0.0)

    # Layer 3: Linear(256 -> 128 padded), then max_action * tanh(.)
    # Padded weight/bias columns are exactly zero -> padded outputs are zero.
    a = jnp.dot(a, w3_ref[...],
                preferred_element_type=jnp.float32) + b3_ref[...]
    out_ref[...] = (max_action * jnp.tanh(a)).astype(out_ref.dtype)


def actor_forward(state, params, max_policy_action, *, batch_tile=256):
    """state: (B, state_dim) f32; params from init_actor_params."""
    w1, b1 = params["w1"], params["b1"]
    w2, b2 = params["w2"], params["b2"]
    w3p, b3p = params["w3_padded"], params["b3_padded"]
    action_dim = params["w3"].shape[1]

    B, state_dim = state.shape

    # Batch tile: multiple of 8 sublanes, capped at `batch_tile` rows.
    TB = min(batch_tile, _round_up(B, 8))
    B_pad = _round_up(B, TB)
    if B_pad != B:
        state = jnp.pad(state, ((0, B_pad - B), (0, 0)))
    grid = (B_pad // TB,)

    kernel = functools.partial(_actor_kernel, float(max_policy_action))

    def tile_map(i):   # batch tile i
        return (i, 0)

    def const_map(i):  # weights/biases: same block every step -> VMEM-resident
        return (0, 0)

    out = pl.pallas_call(
        kernel,
        out_shape=jax.ShapeDtypeStruct((B_pad, _OUT_PAD), jnp.float32),
        grid=grid,
        in_specs=[
            pl.BlockSpec((TB, state_dim), tile_map),      # state tile
            pl.BlockSpec(w1.shape, const_map),            # (state_dim, 256)
            pl.BlockSpec(b1.shape, const_map),            # (1, 256)
            pl.BlockSpec(w2.shape, const_map),            # (256, 256)
            pl.BlockSpec(b2.shape, const_map),            # (1, 256)
            pl.BlockSpec(w3p.shape, const_map),           # (256, 128)
            pl.BlockSpec(b3p.shape, const_map),           # (1, 128)
        ],
        out_specs=pl.BlockSpec((TB, _OUT_PAD), tile_map),  # lane-dense store
        compiler_params=pltpu.CompilerParams(
            dimension_semantics=("parallel",)),            # v7x: 2 TCs share batch
    )(state, w1, b1, w2, b2, w3p, b3p)

    return out[:B, :action_dim]


def init_actor_params(key, state_dim, action_dim, hidden=_HIDDEN):
    """Deterministic init mimicking PyTorch nn.Linear default:
    U(-1/sqrt(fan_in), 1/sqrt(fan_in)) for weight and bias.
    Weights stored as (in_dim, out_dim); layer-3 also kept zero-padded to
    _OUT_PAD output columns for the lane-dense kernel store."""
    def linear(k, fan_in, fan_out):
        kw, kb = jax.random.split(k)
        bound = 1.0 / jnp.sqrt(jnp.float32(fan_in))
        w = jax.random.uniform(kw, (fan_in, fan_out), jnp.float32,
                               minval=-bound, maxval=bound)
        b = jax.random.uniform(kb, (1, fan_out), jnp.float32,
                               minval=-bound, maxval=bound)
        return w, b

    k1, k2, k3 = jax.random.split(key, 3)
    w1, b1 = linear(k1, state_dim, hidden)
    w2, b2 = linear(k2, hidden, hidden)
    w3, b3 = linear(k3, hidden, action_dim)

    # Zero-pad layer 3 to a lane-dense (128-wide) output.
    w3_padded = jnp.pad(w3, ((0, 0), (0, _OUT_PAD - action_dim)))
    b3_padded = jnp.pad(b3, ((0, 0), (0, _OUT_PAD - action_dim)))

    return {"w1": w1, "b1": b1, "w2": w2, "b2": b2,
            "w3": w3, "b3": b3,
            "w3_padded": w3_padded, "b3_padded": b3_padded}


def actor_reference(state, params, max_policy_action):
    a = jnp.maximum(state @ params["w1"] + params["b1"], 0.0)
    a = jnp.maximum(a @ params["w2"] + params["b2"], 0.0)
    return max_policy_action * jnp.tanh(a @ params["w3"] + params["b3"])


if __name__ == "__main__":
    key = jax.random.PRNGKey(0)
    k_params, k_state = jax.random.split(key)

    batch = 2
    state_dim = 8
    action_dim = 4
    max_policy_action = 2.0

    params = init_actor_params(k_params, state_dim, action_dim)
    state = jax.random.normal(k_state, (batch, state_dim), jnp.float32)

    fwd = jax.jit(functools.partial(actor_forward,
                                    max_policy_action=max_policy_action))
    out = fwd(state, params)
    out = jax.block_until_ready(out)

    ref = actor_reference(state, params, max_policy_action)
    assert out.shape == (batch, action_dim)
    assert jnp.allclose(out, ref, atol=1e-5, rtol=1e-5)

    # Also exercise the batch-tiled path (grid > 1) to validate the tiling.
    big_state = jax.random.normal(jax.random.PRNGKey(1), (513, state_dim),
                                  jnp.float32)
    big_out = jax.block_until_ready(fwd(big_state, params))
    big_ref = actor_reference(big_state, params, max_policy_action)
    assert big_out.shape == (513, action_dim)
    assert jnp.allclose(big_out, big_ref, atol=1e-5, rtol=1e-5)

    print("KERNEL_OK")
</pallas_src>

<mosaic_0001>
module attributes {stable_mosaic.version = 11 : i64} {
  func.func @_actor_kernel(%arg0: i32, %arg1: memref<8x8xf32, #tpu.memory_space<vmem>>, %arg2: memref<8x256xf32, #tpu.memory_space<vmem>>, %arg3: memref<1x256xf32, #tpu.memory_space<vmem>>, %arg4: memref<256x256xf32, #tpu.memory_space<vmem>>, %arg5: memref<1x256xf32, #tpu.memory_space<vmem>>, %arg6: memref<256x128xf32, #tpu.memory_space<vmem>>, %arg7: memref<1x128xf32, #tpu.memory_space<vmem>>, %arg8: memref<8x128xf32, #tpu.memory_space<vmem>>) attributes {dimension_semantics = [#tpu.dimension_semantics<parallel>], iteration_bounds = array<i64: 1>, scalar_prefetch = 0 : i64, scratch_operands = 0 : i64, tpu.core_type = #tpu.core_type<tc>, window_params = [{transform_indices = @transform_0, window_bounds = array<i64: 8, 8>}, {pipeline_mode = #tpu.pipeline_mode<synchronous>, transform_indices = @transform_1, window_bounds = array<i64: 8, 256>}, {pipeline_mode = #tpu.pipeline_mode<synchronous>, transform_indices = @transform_2, window_bounds = array<i64: 1, 256>}, {pipeline_mode = #tpu.pipeline_mode<synchronous>, transform_indices = @transform_3, window_bounds = array<i64: 256, 256>}, {pipeline_mode = #tpu.pipeline_mode<synchronous>, transform_indices = @transform_4, window_bounds = array<i64: 1, 256>}, {pipeline_mode = #tpu.pipeline_mode<synchronous>, transform_indices = @transform_5, window_bounds = array<i64: 256, 128>}, {pipeline_mode = #tpu.pipeline_mode<synchronous>, transform_indices = @transform_6, window_bounds = array<i64: 1, 128>}, {transform_indices = @transform_7, window_bounds = array<i64: 8, 128>}]} {
    %c0 = arith.constant 0 : index
    %c0_0 = arith.constant 0 : index
    %0 = vector.load %arg1[%c0, %c0_0] : memref<8x8xf32, #tpu.memory_space<vmem>>, vector<8x8xf32>
    %c0_1 = arith.constant 0 : index
    %c0_2 = arith.constant 0 : index
    %1 = vector.load %arg2[%c0_1, %c0_2] : memref<8x256xf32, #tpu.memory_space<vmem>>, vector<8x256xf32>
    %cst = arith.constant dense<0.000000e+00> : vector<8x256xf32>
    %2 = tpu.matmul %0, %1, %cst {dimension_numbers = #tpu.dot_dimension_numbers<[1], [0], [0], [1], [0, 0, 1, 1], [], []>} : vector<8x8xf32>, vector<8x256xf32>, vector<8x256xf32> -> vector<8x256xf32>
    %c0_3 = arith.constant 0 : index
    %c0_4 = arith.constant 0 : index
    %3 = vector.load %arg3[%c0_3, %c0_4] : memref<1x256xf32, #tpu.memory_space<vmem>>, vector<1x256xf32>
    %4 = vector.broadcast %3 : vector<1x256xf32> to vector<8x256xf32>
    %5 = arith.addf %2, %4 : vector<8x256xf32>
    %cst_5 = arith.constant 0.000000e+00 : f32
    %6 = vector.broadcast %cst_5 : f32 to vector<8x256xf32>
    %7 = arith.maximumf %5, %6 : vector<8x256xf32>
    %c0_6 = arith.constant 0 : index
    %c0_7 = arith.constant 0 : index
    %8 = vector.load %arg4[%c0_6, %c0_7] : memref<256x256xf32, #tpu.memory_space<vmem>>, vector<256x256xf32>
    %cst_8 = arith.constant dense<0.000000e+00> : vector<8x256xf32>
    %9 = tpu.matmul %7, %8, %cst_8 {dimension_numbers = #tpu.dot_dimension_numbers<[1], [0], [0], [1], [0, 0, 1, 1], [], []>} : vector<8x256xf32>, vector<256x256xf32>, vector<8x256xf32> -> vector<8x256xf32>
    %c0_9 = arith.constant 0 : index
    %c0_10 = arith.constant 0 : index
    %10 = vector.load %arg5[%c0_9, %c0_10] : memref<1x256xf32, #tpu.memory_space<vmem>>, vector<1x256xf32>
    %11 = vector.broadcast %10 : vector<1x256xf32> to vector<8x256xf32>
    %12 = arith.addf %9, %11 : vector<8x256xf32>
    %cst_11 = arith.constant 0.000000e+00 : f32
    %13 = vector.broadcast %cst_11 : f32 to vector<8x256xf32>
    %14 = arith.maximumf %12, %13 : vector<8x256xf32>
    %c0_12 = arith.constant 0 : index
    %c0_13 = arith.constant 0 : index
    %15 = vector.load %arg6[%c0_12, %c0_13] : memref<256x128xf32, #tpu.memory_space<vmem>>, vector<256x128xf32>
    %cst_14 = arith.constant dense<0.000000e+00> : vector<8x128xf32>
    %16 = tpu.matmul %14, %15, %cst_14 {dimension_numbers = #tpu.dot_dimension_numbers<[1], [0], [0], [1], [0, 0, 1, 1], [], []>} : vector<8x256xf32>, vector<256x128xf32>, vector<8x128xf32> -> vector<8x128xf32>
    %c0_15 = arith.constant 0 : index
    %c0_16 = arith.constant 0 : index
    %17 = vector.load %arg7[%c0_15, %c0_16] : memref<1x128xf32, #tpu.memory_space<vmem>>, vector<1x128xf32>
    %18 = vector.broadcast %17 : vector<1x128xf32> to vector<8x128xf32>
    %19 = arith.addf %16, %18 : vector<8x128xf32>
    %20 = math.tanh %19 : vector<8x128xf32>
    %cst_17 = arith.constant 2.000000e+00 : f32
    %21 = vector.broadcast %cst_17 : f32 to vector<8x128xf32>
    %22 = arith.mulf %21, %20 : vector<8x128xf32>
    %c0_18 = arith.constant 0 : index
    %c0_19 = arith.constant 0 : index
    %23 = vector.load %arg8[%c0_18, %c0_19] : memref<8x128xf32, #tpu.memory_space<vmem>>, vector<8x128xf32>
    tpu.vector_store %arg8[%c0_18, %c0_19], %22 {strides = array<i32>} : memref<8x128xf32, #tpu.memory_space<vmem>>, vector<8x128xf32>,
    return
  }
  func.func @transform_0(%arg0: i32) -> (i32, i32) {
    %c0_i32 = arith.constant 0 : i32
    %c0_i32_0 = arith.constant 0 : i32
    return %arg0, %c0_i32 : i32, i32
  }
  func.func @transform_1(%arg0: i32) -> (i32, i32) {
    %c0_i32 = arith.constant 0 : i32
    %c0_i32_0 = arith.constant 0 : i32
    %c0_i32_1 = arith.constant 0 : i32
    return %c0_i32, %c0_i32_0 : i32, i32
  }
  func.func @transform_2(%arg0: i32) -> (i32, i32) {
    %c0_i32 = arith.constant 0 : i32
    %c0_i32_0 = arith.constant 0 : i32
    %c0_i32_1 = arith.constant 0 : i32
    return %c0_i32, %c0_i32_0 : i32, i32
  }
  func.func @transform_3(%arg0: i32) -> (i32, i32) {
    %c0_i32 = arith.constant 0 : i32
    %c0_i32_0 = arith.constant 0 : i32
    %c0_i32_1 = arith.constant 0 : i32
    return %c0_i32, %c0_i32_0 : i32, i32
  }
  func.func @transform_4(%arg0: i32) -> (i32, i32) {
    %c0_i32 = arith.constant 0 : i32
    %c0_i32_0 = arith.constant 0 : i32
    %c0_i32_1 = arith.constant 0 : i32
    return %c0_i32, %c0_i32_0 : i32, i32
  }
  func.func @transform_5(%arg0: i32) -> (i32, i32) {
    %c0_i32 = arith.constant 0 : i32
    %c0_i32_0 = arith.constant 0 : i32
    %c0_i32_1 = arith.constant 0 : i32
    return %c0_i32, %c0_i32_0 : i32, i32
  }
  func.func @transform_6(%arg0: i32) -> (i32, i32) {
    %c0_i32 = arith.constant 0 : i32
    %c0_i32_0 = arith.constant 0 : i32
    %c0_i32_1 = arith.constant 0 : i32
    return %c0_i32, %c0_i32_0 : i32, i32
  }
  func.func @transform_7(%arg0: i32) -> (i32, i32) {
    %c0_i32 = arith.constant 0 : i32
    %c0_i32_0 = arith.constant 0 : i32
    return %arg0, %c0_i32 : i32, i32
  }
}

</mosaic_0001>

<bundles_post_ra>
// kernel: actor_forward.1
= control target key start
LH: loop header
LB: loop body
LE: loop exit
PB: predicated region body
PF: predicated region fallthrough
CT: control target
= control target key end

     0   :  { %12 = vsyncpa [#allocation3], 0  ;;  %s647_s0 = inlined_call_operand.vmem [shape: f32[8,8], index: 0, kind: input, shape index: {}]   ;;  %s648_s1 = inlined_call_operand.vmem [shape: f32[8,256], index: 1, kind: input, shape index: {}]   ;;  %s649_s2 = inlined_call_operand.vmem [shape: f32[1,256], index: 2, kind: input, shape index: {}]   ;;  %s650_s3 = inlined_call_operand.hbm [shape: f32[256,256], index: 3, kind: input, shape index: {}]   ;;  %s651_s4 = inlined_call_operand.hbm [shape: f32[1,256], index: 4, kind: input, shape index: {}]   ;;  %s652_s5 = inlined_call_operand.hbm [shape: f32[256,128], index: 5, kind: input, shape index: {}]   ;;  %s653_s6 = inlined_call_operand.hbm [shape: f32[1,128], index: 6, kind: input, shape index: {}]   ;;  %s654_s7 = inlined_call_operand.vmem [shape: f32[8,128], index: 7, kind: output, shape index: {}]  }
   0x1   :  { %13 = vsyncpa [#allocation5], 0 }
   0x2   :  { %14 = vsyncpa [#allocation8], 0  ;;  %s571_s24 = smov [#allocation4]   ;;  %s572_s26 = smov [#allocation2]  }
   0x3   :  { %s39_s25 = sshll.u32 %s571_s24, 4  ;;  %s26_s27 = sshll.u32 %s572_s26, 4  ;;  %s40_s25 = int_to_ptr.vmem [resolvable:$true] %s39_s25  ;;  %s27_s27 = int_to_ptr.vmem [resolvable:$true] %s26_s27 }
   0x4   :  { %s493_s28 = scalar_lea.vmem %s40_s25, 32  ;;  %p498_p1 = scmp.lt.s32.totalorder %s40_s25, %s40_s25 }
   0x5   :  { %p494_p0 = scmp.ne.s32.totalorder %s40_s25, %s493_s28  ;;  %p499_p2 = scmp.lt.s32.totalorder %s493_s28, %s493_s28 }
   0x7   :  { %p500_p3 = por %p499_p2, %p498_p1 }
   0x9   :  { %p501_p4 = pnand %p500_p3, %p494_p0 }
   0xb   :  { %504 = shalt.err (!%p501_p4)
}
   0xc   :  { %42 = dma.hbm_to_vmem [thread:$0]  %s651_s4, 32, %s40_s25, [#allocation5]  }
   0xd   :  { %s513_s8 = scalar_lea.vmem %s27_s27, 8192  ;;  %p518_p6 = scmp.lt.s32.totalorder %s27_s27, %s27_s27 }
   0xe   :  { %p514_p5 = scmp.ne.s32.totalorder %s27_s27, %s513_s8  ;;  %p519_p7 = scmp.lt.s32.totalorder %s513_s8, %s513_s8 }
  0x10   :  { %p520_p8 = por %p519_p7, %p518_p6 }
  0x12   :  { %p521_p9 = pnand %p520_p8, %p514_p5 }
  0x14   :  { %524 = shalt.err (!%p521_p9)
}
  0x15   :  { %s573_s9 = smov 256   ;;  %s574_s10 = smov 16  }
  0x16   :  { %32 = dma.hbm_to_vmem [thread:$0]  %s650_s3, 8192, %s27_s27, [#allocation3], %s573_s9, %s573_s9, %s574_s10  }
  0x17   :  { %s575_s13 = smov [#allocation6]  }
  0x18   :  { %s48_s14 = sshll.u32 %s575_s13, 4  ;;  %s49_s14 = int_to_ptr.vmem [resolvable:$true] %s48_s14 }
  0x19   :  { %s533_s15 = scalar_lea.vmem %s49_s14, 4096  ;;  %p538_p11 = scmp.lt.s32.totalorder %s49_s14, %s49_s14 }
  0x1a   :  { %p534_p10 = scmp.ne.s32.totalorder %s49_s14, %s533_s15  ;;  %p539_p12 = scmp.lt.s32.totalorder %s533_s15, %s533_s15 }
  0x1c   :  { %p540_p13 = por %p539_p12, %p538_p11 }
  0x1e   :  { %p541_p0 = pnand %p540_p13, %p534_p10 }
  0x20   :  { %544 = shalt.err (!%p541_p0)
}
  0x21   :  { %s576_s4 = smov 128   ;;  %s577_s16 = smov 8  }
  0x22   :  { %54 = dma.hbm_to_vmem [thread:$0]  %s652_s5, 4096, %s49_s14, [#allocation5], %s576_s4, %s576_s4, %s577_s16  }
  0x23   :  { %s578_s19 = smov [#allocation7]  }
  0x24   :  { %s61_s20 = sshll.u32 %s578_s19, 4  ;;  %s62_s20 = int_to_ptr.vmem [resolvable:$true] %s61_s20 }
  0x25   :  { %s553_s3 = scalar_lea.vmem %s62_s20, 16  ;;  %s557_s21 = scalar_lea.vmem %s62_s20, 32 }
  0x26   :  { %p554_p1 = scmp.ne.s32.totalorder %s62_s20, %s553_s3  ;;  %p558_p2 = scmp.lt.s32.totalorder %s62_s20, %s62_s20 }
  0x27   :  { %p559_p3 = scmp.lt.s32.totalorder %s557_s21, %s553_s3 }
  0x29   :  { %p560_p4 = por %p559_p3, %p558_p2 }
  0x2b   :  { %p561_p5 = pnand %p560_p4, %p554_p1 }
  0x2d   :  { %564 = shalt.err (!%p561_p5)
}
  0x2e   :  { %64 = dma.hbm_to_vmem [thread:$0]  %s653_s6, 16, %s62_s20, [#allocation8]  }
  0x2f   :  { %565 = dma.done.wait [#allocation3], 8192  }
  0x30   :  { %566 = vsyncadd [#allocation3], 4294959104 }
  0x31   :  { %567 = dma.done.wait [#allocation5], 4128  }
  0x32   :  { %568 = vsyncadd [#allocation5], 4294963168 }
  0x33   :  { %569 = dma.done.wait [#allocation8], 16  }
  0x34   :  { %570 = vsyncadd [#allocation8], 4294967280  ;;  %v579_v0 = vmov 0.0   ;;  %v79_v1 = vld [vmem:[%s648_s1 + $0x8] sm:$0xff]  ;;  %v78_v2 = vld [vmem:[%s648_s1] sm:$0xff]  ;;  %vm92_vm0 = vcmask 64512  }
  0x35   :  { %160 = vmatprep.mubr.f32.mxu0 %v579_v0  ;;  %v77_v3 = vld [vmem:[%s647_s0] sm:$0xff]  ;;  %126 = vmatprep.subr.mxu0 %v79_v1  ;;  %v200_v4 = vld [vmem:[#allocation2 + $0xf8] sm:$0xff]  ;;  %v199_v5 = vld [vmem:[#allocation2 + $0xf0] sm:$0xff] }
  0x36   :  { %v198_v6 = vld [vmem:[#allocation2 + $0xe8] sm:$0xff]  ;;  %127 = vmatpush1.msra.mxu0 %v78_v2  ;;  %245 = vmatprep.subr.mxu1 %v200_v4  ;;  %v197_v7 = vld [vmem:[#allocation2 + $0xe0] sm:$0xff]  ;;  %v196_v8 = vld [vmem:[#allocation2 + $0xd8] sm:$0xff] }
  0x37   :  { %437 = vmatmul.mubr.msk.f32.vlgmr.msra.gmra.mxu0 %vm92_vm0, %v77_v3  ;;  %246 = vmatpush1.msra.mxu1 %v199_v5  ;;  %v195_v9 = vld [vmem:[#allocation2 + $0xd0] sm:$0xff]  ;;  %v194_v10 = vld [vmem:[#allocation2 + $0xc8] sm:$0xff]  ;;  %v193_v11 = vld [vmem:[#allocation2 + $0xc0] sm:$0xff] }
  0x38   :  { %247 = vmatprep.subr.mxu1 %v198_v6  ;;  %v192_v12 = vld [vmem:[#allocation2 + $0xb8] sm:$0xff]  ;;  %v191_v13 = vld [vmem:[#allocation2 + $0xb0] sm:$0xff]  ;;  %v190_v14 = vld [vmem:[#allocation2 + $0xa8] sm:$0xff] }
  0x39   :  { %248 = vmatpush1.msra.mxu1 %v197_v7  ;;  %v189_v15 = vld [vmem:[#allocation2 + $0xa0] sm:$0xff]  ;;  %v188_v16 = vld [vmem:[#allocation2 + $0x98] sm:$0xff]  ;;  %v187_v17 = vld [vmem:[#allocation2 + $0x90] sm:$0xff] }
  0x3a   :  { %249 = vmatprep.subr.mxu1 %v196_v8  ;;  %v186_v18 = vld [vmem:[#allocation2 + $0x88] sm:$0xff]  ;;  %v185_v19 = vld [vmem:[#allocation2 + $0x80] sm:$0xff]  ;;  %v184_v20 = vld [vmem:[#allocation2 + $0x78] sm:$0xff] }
  0x3b   :  { %250 = vmatpush1.msra.mxu1 %v195_v9  ;;  %v183_v21 = vld [vmem:[#allocation2 + $0x70] sm:$0xff]  ;;  %v182_v22 = vld [vmem:[#allocation2 + $0x68] sm:$0xff]  ;;  %v181_v23 = vld [vmem:[#allocation2 + $0x60] sm:$0xff] }
  0x3c   :  { %251 = vmatprep.subr.mxu1 %v194_v10  ;;  %v180_v24 = vld [vmem:[#allocation2 + $0x58] sm:$0xff]  ;;  %v179_v25 = vld [vmem:[#allocation2 + $0x50] sm:$0xff]  ;;  %v178_v26 = vld [vmem:[#allocation2 + $0x48] sm:$0xff] }
  0x3d   :  { %252 = vmatpush1.msra.mxu1 %v193_v11  ;;  %v177_v27 = vld [vmem:[#allocation2 + $0x40] sm:$0xff]  ;;  %v176_v28 = vld [vmem:[#allocation2 + $0x38] sm:$0xff]  ;;  %v175_v29 = vld [vmem:[#allocation2 + $0x30] sm:$0xff] }
  0x3e   :  { %253 = vmatprep.subr.mxu1 %v192_v12  ;;  %v174_v30 = vld [vmem:[#allocation2 + $0x28] sm:$0xff]  ;;  %v173_v31 = vld [vmem:[#allocation2 + $0x20] sm:$0xff]  ;;  %v172_v32 = vld [vmem:[#allocation2 + $0x18] sm:$0xff] }
  0x3f   :  { %254 = vmatpush1.msra.mxu1 %v191_v13  ;;  %v171_v33 = vld [vmem:[#allocation2 + $0x10] sm:$0xff]  ;;  %v170_v34 = vld [vmem:[#allocation2 + $0x8] sm:$0xff]  ;;  %v169_v35 = vld [vmem:[#allocation2] sm:$0xff] }
  0x40   :  { %255 = vmatprep.subr.mxu1 %v190_v14  ;;  %v232_v36 = vld [vmem:[#allocation2 + $0x1f8] sm:$0xff]  ;;  %v231_v37 = vld [vmem:[#allocation2 + $0x1f0] sm:$0xff]  ;;  %v230_v38 = vld [vmem:[#allocation2 + $0x1e8] sm:$0xff] }
  0x41   :  { %256 = vmatpush1.msra.mxu1 %v189_v15  ;;  %v229_v39 = vld [vmem:[#allocation2 + $0x1e0] sm:$0xff]  ;;  %v228_v40 = vld [vmem:[#allocation2 + $0x1d8] sm:$0xff]  ;;  %v227_v41 = vld [vmem:[#allocation2 + $0x1d0] sm:$0xff] }
  0x42   :  { %257 = vmatprep.subr.mxu1 %v188_v16  ;;  %v226_v42 = vld [vmem:[#allocation2 + $0x1c8] sm:$0xff]  ;;  %v225_v43 = vld [vmem:[#allocation2 + $0x1c0] sm:$0xff]  ;;  %v224_v44 = vld [vmem:[#allocation2 + $0x1b8] sm:$0xff] }
  0x43   :  { %258 = vmatpush1.msra.mxu1 %v187_v17  ;;  %v223_v45 = vld [vmem:[#allocation2 + $0x1b0] sm:$0xff]  ;;  %v222_v46 = vld [vmem:[#allocation2 + $0x1a8] sm:$0xff]  ;;  %v221_v47 = vld [vmem:[#allocation2 + $0x1a0] sm:$0xff] }
  0x44   :  { %259 = vmatprep.subr.mxu1 %v186_v18  ;;  %v220_v48 = vld [vmem:[#allocation2 + $0x198] sm:$0xff]  ;;  %v219_v49 = vld [vmem:[#allocation2 + $0x190] sm:$0xff]  ;;  %v218_v50 = vld [vmem:[#allocation2 + $0x188] sm:$0xff] }
  0x45   :  { %260 = vmatpush1.msra.mxu1 %v185_v19  ;;  %v217_v51 = vld [vmem:[#allocation2 + $0x180] sm:$0xff]  ;;  %v216_v52 = vld [vmem:[#allocation2 + $0x178] sm:$0xff]  ;;  %v215_v53 = vld [vmem:[#allocation2 + $0x170] sm:$0xff] }
  0x46   :  { %261 = vmatprep.subr.mxu1 %v184_v20  ;;  %v214_v54 = vld [vmem:[#allocation2 + $0x168] sm:$0xff]  ;;  %v213_v55 = vld [vmem:[#allocation2 + $0x160] sm:$0xff]  ;;  %v212_v56 = vld [vmem:[#allocation2 + $0x158] sm:$0xff] }
  0x47   :  { %262 = vmatpush1.msra.mxu1 %v183_v21  ;;  %v211_v57 = vld [vmem:[#allocation2 + $0x150] sm:$0xff]  ;;  %v210_v58 = vld [vmem:[#allocation2 + $0x148] sm:$0xff]  ;;  %v209_v59 = vld [vmem:[#allocation2 + $0x140] sm:$0xff] }
  0x48   :  { %263 = vmatprep.subr.mxu1 %v182_v22  ;;  %v208_v60 = vld [vmem:[#allocation2 + $0x138] sm:$0xff]  ;;  %v207_v61 = vld [vmem:[#allocation2 + $0x130] sm:$0xff]  ;;  %v206_v62 = vld [vmem:[#allocation2 + $0x128] sm:$0xff] }
  0x49   :  { %264 = vmatpush1.msra.mxu1 %v181_v23  ;;  %v205_v63 = vld [vmem:[#allocation2 + $0x120] sm:$0xff]  ;;  %v204_v0 = vld [vmem:[#allocation2 + $0x118] sm:$0xff]  ;;  %v203_v1 = vld [vmem:[#allocation2 + $0x110] sm:$0xff] }
  0x4a   :  { %265 = vmatprep.subr.mxu1 %v180_v24  ;;  %v202_v2 = vld [vmem:[#allocation2 + $0x108] sm:$0xff]  ;;  %v201_v3 = vld [vmem:[#allocation2 + $0x100] sm:$0xff]  ;;  %v348_v6 = vld [vmem:[#allocation6 + $0xf0] sm:$0xff] }
  0x4b   :  { %266 = vmatpush1.msra.mxu1 %v179_v25  ;;  %v349_v4 = vld [vmem:[#allocation6 + $0xf8] sm:$0xff]  ;;  %v332_v7 = vld [vmem:[#allocation6 + $0x70] sm:$0xff]  ;;  %v347_v8 = vld [vmem:[#allocation6 + $0xe8] sm:$0xff] }
  0x4c   :  { %267 = vmatprep.subr.mxu1 %v178_v26  ;;  %v333_v5 = vld [vmem:[#allocation6 + $0x78] sm:$0xff]  ;;  %439 = vmatprep.subr.mxu0 %v349_v4  ;;  %v331_v9 = vld [vmem:[#allocation6 + $0x68] sm:$0xff]  ;;  %v346_v10 = vld [vmem:[#allocation6 + $0xe0] sm:$0xff] }
  0x4d   :  { %268 = vmatpush1.msra.mxu1 %v177_v27  ;;  %440 = vmatpush3.msra.mxu0 %v333_v5  ;;  %v330_v11 = vld [vmem:[#allocation6 + $0x60] sm:$0xff]  ;;  %v345_v12 = vld [vmem:[#allocation6 + $0xd8] sm:$0xff]  ;;  %v344_v14 = vld [vmem:[#allocation6 + $0xd0] sm:$0xff] }
  0x4e   :  { %269 = vmatprep.subr.mxu1 %v176_v28  ;;  %441 = vmatprep.subr.mxu0 %v348_v6  ;;  %v329_v13 = vld [vmem:[#allocation6 + $0x58] sm:$0xff]  ;;  %v328_v15 = vld [vmem:[#allocation6 + $0x50] sm:$0xff]  ;;  %v343_v16 = vld [vmem:[#allocation6 + $0xc8] sm:$0xff]  ;;  %v82_v28 = vlaneseq }
  0x4f   :  { %270 = vmatpush1.msra.mxu1 %v175_v29  ;;  %442 = vmatpush3.msra.mxu0 %v332_v7  ;;  %v327_v17 = vld [vmem:[#allocation6 + $0x48] sm:$0xff]  ;;  %v342_v18 = vld [vmem:[#allocation6 + $0xc0] sm:$0xff]  ;;  %v341_v20 = vld [vmem:[#allocation6 + $0xb8] sm:$0xff] }
  0x50   :  { %271 = vmatprep.subr.mxu1 %v174_v30  ;;  %443 = vmatprep.subr.mxu0 %v347_v8  ;;  %v326_v19 = vld [vmem:[#allocation6 + $0x40] sm:$0xff]  ;;  %v325_v21 = vld [vmem:[#allocation6 + $0x38] sm:$0xff]  ;;  %v340_v22 = vld [vmem:[#allocation6 + $0xb0] sm:$0xff]  ;;  %v83_v29 = vshrl.u32 %v82_v28, 7 }
  0x51   :  { %272 = vmatpush1.msra.mxu1 %v173_v31  ;;  %444 = vmatpush3.msra.mxu0 %v331_v9  ;;  %v324_v23 = vld [vmem:[#allocation6 + $0x30] sm:$0xff]  ;;  %v339_v24 = vld [vmem:[#allocation6 + $0xa8] sm:$0xff]  ;;  %v338_v26 = vld [vmem:[#allocation6 + $0xa0] sm:$0xff] }
  0x52   :  { %273 = vmatprep.subr.mxu1 %v172_v32  ;;  %445 = vmatprep.subr.mxu0 %v346_v10  ;;  %v323_v25 = vld [vmem:[#allocation6 + $0x28] sm:$0xff]  ;;  %v322_v27 = vld [vmem:[#allocation6 + $0x20] sm:$0xff]  ;;  %v84_v30 = vsub.s32 0, %v83_v29  ;;  %v80_v31 = vld [vmem:[%s649_s2] sm:$0x3]  ;;  %v88_v32 = vsub.s32 1, %v83_v29 }
  0x53   :  { %274 = vmatpush1.msra.mxu1 %v171_v33  ;;  %446 = vmatpush3.msra.mxu0 %v330_v11 }
  0x54   :  { %275 = vmatprep.subr.mxu1 %v170_v34  ;;  %447 = vmatprep.subr.mxu0 %v345_v12  ;;  %v85_v33 = vrot.slane %v80_v31, %v84_v30  ;;  %v89_v34 = vrot.slane %v80_v31, %v88_v32 }
  0x55   :  { %276 = vmatpush1.msra.mxu1 %v169_v35  ;;  %448 = vmatpush3.msra.mxu0 %v329_v13 }
  0x56   :  { %277 = vmatprep.subr.mxu1 %v232_v36  ;;  %449 = vmatprep.subr.mxu0 %v344_v14 }
  0x57   :  { %278 = vmatpush2.msra.mxu1 %v231_v37  ;;  %450 = vmatpush3.msra.mxu0 %v328_v15 }
  0x58   :  { %279 = vmatprep.subr.mxu1 %v230_v38  ;;  %451 = vmatprep.subr.mxu0 %v343_v16 }
  0x59   :  { %280 = vmatpush2.msra.mxu1 %v229_v39  ;;  %452 = vmatpush3.msra.mxu0 %v327_v17 }
  0x5a   :  { %281 = vmatprep.subr.mxu1 %v228_v40  ;;  %453 = vmatprep.subr.mxu0 %v342_v18 }
  0x5b   :  { %282 = vmatpush2.msra.mxu1 %v227_v41  ;;  %454 = vmatpush3.msra.mxu0 %v326_v19  ;;  %v337_v41 = vld [vmem:[#allocation6 + $0x98] sm:$0xff] }
  0x5c   :  { %283 = vmatprep.subr.mxu1 %v226_v42  ;;  %455 = vmatprep.subr.mxu0 %v341_v20  ;;  %v321_v42 = vld [vmem:[#allocation6 + $0x18] sm:$0xff] }
  0x5d   :  { %284 = vmatpush2.msra.mxu1 %v225_v43  ;;  %456 = vmatpush3.msra.mxu0 %v325_v21  ;;  %v336_v43 = vld [vmem:[#allocation6 + $0x90] sm:$0xff] }
  0x5e   :  { %285 = vmatprep.subr.mxu1 %v224_v44  ;;  %457 = vmatprep.subr.mxu0 %v340_v22  ;;  %v320_v44 = vld [vmem:[#allocation6 + $0x10] sm:$0xff] }
  0x5f   :  { %286 = vmatpush2.msra.mxu1 %v223_v45  ;;  %458 = vmatpush3.msra.mxu0 %v324_v23  ;;  %v335_v45 = vld [vmem:[#allocation6 + $0x88] sm:$0xff] }
  0x60   :  { %287 = vmatprep.subr.mxu1 %v222_v46  ;;  %459 = vmatprep.subr.mxu0 %v339_v24  ;;  %v319_v46 = vld [vmem:[#allocation6 + $0x8] sm:$0xff] }
  0x61   :  { %288 = vmatpush2.msra.mxu1 %v221_v47  ;;  %460 = vmatpush3.msra.mxu0 %v323_v25  ;;  %v334_v47 = vld [vmem:[#allocation6 + $0x80] sm:$0xff] }
  0x62   :  { %289 = vmatprep.subr.mxu1 %v220_v48  ;;  %461 = vmatprep.subr.mxu0 %v338_v26  ;;  %v318_v48 = vld [vmem:[#allocation6] sm:$0xff] }
  0x63   :  { %290 = vmatpush2.msra.mxu1 %v219_v49  ;;  %462 = vmatpush3.msra.mxu0 %v322_v27  ;;  %v233_v49 = vld [vmem:[#allocation4] sm:$0x3] }
  0x64   :  { %291 = vmatprep.subr.mxu1 %v218_v50  ;;  %463 = vmatprep.subr.mxu0 %v337_v41  ;;  %v238_v50 = vrot.slane %v233_v49, %v84_v30 }
  0x65   :  { %292 = vmatpush2.msra.mxu1 %v217_v51  ;;  %464 = vmatpush3.msra.mxu0 %v321_v42  ;;  %v242_v51 = vrot.slane %v233_v49, %v88_v32 }
  0x66   :  { %293 = vmatprep.subr.mxu1 %v216_v52  ;;  %465 = vmatprep.subr.mxu0 %v336_v43 }
  0x67   :  { %294 = vmatpush2.msra.mxu1 %v215_v53  ;;  %466 = vmatpush3.msra.mxu0 %v320_v44 }
  0x68   :  { %295 = vmatprep.subr.mxu1 %v214_v54  ;;  %467 = vmatprep.subr.mxu0 %v335_v45 }
  0x69   :  { %296 = vmatpush2.msra.mxu1 %v213_v55  ;;  %468 = vmatpush3.msra.mxu0 %v319_v46 }
  0x6a   :  { %297 = vmatprep.subr.mxu1 %v212_v56  ;;  %469 = vmatprep.subr.mxu0 %v334_v47 }
  0x6b   :  { %298 = vmatpush2.msra.mxu1 %v211_v57  ;;  %470 = vmatpush3.msra.mxu0 %v318_v48 }
  0x6c   :  { %299 = vmatprep.subr.mxu1 %v210_v58 }
  0x6d   :  { %300 = vmatpush2.msra.mxu1 %v209_v59  ;;  %v438_v59 = vld [vmem:[#allocation7] ss:$0 sm:$0xff] }
  0x6e   :  { %301 = vmatprep.subr.mxu1 %v208_v60 }
  0x6f   :  { %302 = vmatpush2.msra.mxu1 %v207_v61 }
  0x70   :  { %303 = vmatprep.subr.mxu1 %v206_v62 }
  0x71   :  { %304 = vmatpush2.msra.mxu1 %v205_v63 }
  0x72   :  { %305 = vmatprep.subr.mxu1 %v204_v0 }
  0x73   :  { %306 = vmatpush2.msra.mxu1 %v203_v1 }
  0x74   :  { %307 = vmatprep.subr.mxu1 %v202_v2 }
  0x75   :  { %308 = vmatpush2.msra.mxu1 %v201_v3 }
  0xf7   :  { %v162_v35 = vpop.f32.mrf.mxu0 }
  0xf8   :  { %v163_v36 = vadd.f32 %v162_v35, %v85_v33 }
  0xf9   :  { %v164_v37 = vpop.f32.mrf.mxu0 }
  0xfa   :  { %v165_v38 = vadd.f32 %v164_v37, %v89_v34  ;;  %v167_v40 = vmax.f32 %v163_v36, 0.0 }
  0xfc   :  { %v168_v39 = vmax.f32 %v165_v38, 0.0 }
  0xfe   :  { %309 = vmatprep.mubr.f32.mxu1 %v168_v39 }
  0xff   :  { %310 = vmatmul.mubr.f32.vlgmr.msra.gmra.mxu1 %v167_v40 }
 0x1bf   :  { %v311_v52 = vpop.f32.mrf.mxu1 }
 0x1c0   :  { %v312_v53 = vadd.f32 %v311_v52, %v238_v50 }
 0x1c1   :  { %v313_v54 = vpop.f32.mrf.mxu1 }
 0x1c2   :  { %v314_v55 = vadd.f32 %v313_v54, %v242_v51  ;;  %v316_v57 = vmax.f32 %v312_v53, 0.0 }
 0x1c4   :  { %v317_v56 = vmax.f32 %v314_v55, 0.0 }
 0x1c6   :  { %421 = vmatprep.mubr.f32.mxu0 %v317_v56 }
 0x1c7   :  { %422 = vmatmul.mubr.f32.vlgmr.msra.gmra.mxu0 %v316_v57 }
 0x287   :  { %v471_v58 = vpop.f32.mrf.mxu0 }
 0x289   :  { %v472_v60 = vpop.f32.mrf.mxu0 }
 0x28a   :  { %v473_v61 = vadd.f32 %v472_v60, %v471_v58 }
 0x28c   :  { %v424_v62 = vadd.f32 %v473_v61, %v438_v59 }
 0x28e   :  { %483 = vtanh.f32 %v424_v62 }
 0x29b   :  { %v484_v63 = vpop.eup %483 }
 0x29c   :  { %v428_v0 = vmul.f32 2.0, %v484_v63 }
 0x29e   :  { %429 = vst [vmem:[%s654_s7] sm:$0xff] %v428_v0 }
 0x29f   :  { %434 = vsyncpa [#allocation3], 1 }
 0x2a0   :  { %435 = vsyncpa [#allocation5], 1 }
 0x2a1   :  { %436 = vsyncpa [#allocation8], 1 }

</bundles_post_ra>
